<compile_context>
chip_gen: v5e
topology: v5e:2x2
jax: 0.10.0
libtpu: 0.0.40
codegen_flags: <defaults>
</compile_context>

<pallas_src>
import functools

import jax
import jax.numpy as jnp
from jax.experimental import pallas as pl
from jax.experimental.pallas import tpu as pltpu

_LANE = 128
_SUBLANE = 8


def _round_up(x, m):
    return (x + m - 1) // m * m


# --------------------------------------------------------------------------- #
# Kernels (one variant with the feature writeback, one without).
# Per grid step the body sees one (TB, 784) f32 tile of x; all (padded, bf16)
# weights / (f32) biases stay resident in VMEM across the whole grid.
# --------------------------------------------------------------------------- #
def _kernel_with_feat(x_ref, wpre_ref, bpre_ref, w1_ref, b1_ref, w2_ref, b2_ref,
                      out_ref, feat_ref):
    # x streamed from HBM in native f32; cast to bf16 in-VMEM so all three
    # matmuls run on the fast bf16 MXU path (f32 accumulation throughout).
    x_bf16 = x_ref[...].astype(jnp.bfloat16)
    # Synthetic pretrained block_2 activation (squeeze(1) already applied).
    feat = jnp.tanh(
        jnp.dot(x_bf16, wpre_ref[...], preferred_element_type=jnp.float32)
        + bpre_ref[...]
    )
    feat_bf16 = feat.astype(jnp.bfloat16)
    feat_ref[...] = feat_bf16                       # lane-dense bf16, unmasked vst
    # output_layer: Linear -> ReLU -> Dropout(identity, eval) -> Linear
    h = jnp.maximum(
        jnp.dot(feat_bf16, w1_ref[...], preferred_element_type=jnp.float32)
        + b1_ref[...],
        0.0,
    )
    logits = (
        jnp.dot(h.astype(jnp.bfloat16), w2_ref[...],
                preferred_element_type=jnp.float32)
        + b2_ref[...]
    )
    out_ref[...] = logits.astype(jnp.bfloat16)      # lane-dense (TB, 128) bf16


def _kernel_no_feat(x_ref, wpre_ref, bpre_ref, w1_ref, b1_ref, w2_ref, b2_ref,
                    out_ref):
    x_bf16 = x_ref[...].astype(jnp.bfloat16)
    feat = jnp.tanh(
        jnp.dot(x_bf16, wpre_ref[...], preferred_element_type=jnp.float32)
        + bpre_ref[...]
    )
    h = jnp.maximum(
        jnp.dot(feat.astype(jnp.bfloat16), w1_ref[...],
                preferred_element_type=jnp.float32)
        + b1_ref[...],
        0.0,
    )
    logits = (
        jnp.dot(h.astype(jnp.bfloat16), w2_ref[...],
                preferred_element_type=jnp.float32)
        + b2_ref[...]
    )
    out_ref[...] = logits.astype(jnp.bfloat16)


# --------------------------------------------------------------------------- #
# One-time weight preparation (hoisted out of the per-call path).
# --------------------------------------------------------------------------- #
def prepare_params(params):
    """Pad / cast the weights once; reuse the result for every forward call.

    - wpre/bpre columns padded so H -> H_pad (multiple of 128): lane-dense feat.
    - w1 rows padded to H_pad (zeros => no contribution from padded feat lanes).
    - w2/b2 columns padded so C -> C_pad (multiple of 128): lane-dense logits.
    - All weight matrices stored bf16 (fast MXU path); biases stay f32.
    """
    wpre, bpre = params["wpre"], params["bpre"]
    w1, b1 = params["w1"], params["b1"]
    w2, b2 = params["w2"], params["b2"]
    D, H = wpre.shape
    H2 = w1.shape[1]
    C = w2.shape[1]
    H_pad = _round_up(H, _LANE)
    C_pad = _round_up(C, _LANE)

    wpre_p = jnp.zeros((D, H_pad), jnp.bfloat16).at[:, :H].set(
        wpre.astype(jnp.bfloat16))
    bpre_p = jnp.zeros((1, H_pad), jnp.float32).at[:, :H].set(
        bpre.astype(jnp.float32).reshape(1, H))
    w1_p = jnp.zeros((H_pad, H2), jnp.bfloat16).at[:H, :].set(
        w1.astype(jnp.bfloat16))
    b1_p = b1.astype(jnp.float32).reshape(1, H2)
    w2_p = jnp.zeros((H2, C_pad), jnp.bfloat16).at[:, :C].set(
        w2.astype(jnp.bfloat16))
    b2_p = jnp.zeros((1, C_pad), jnp.float32).at[:, :C].set(
        b2.astype(jnp.float32).reshape(1, C))

    weights = dict(wpre=wpre_p, bpre=bpre_p, w1=w1_p, b1=b1_p, w2=w2_p, b2=b2_p)
    meta = dict(hidden_dim=H, num_classes=C)
    return weights, meta


# --------------------------------------------------------------------------- #
# Jitted forward
# --------------------------------------------------------------------------- #
@functools.partial(
    jax.jit,
    static_argnames=("hidden_dim", "num_classes", "return_features",
                     "batch_tile", "vmem_limit_mb"),
)
def _forward_impl(x_nchw, wpre, bpre, w1, b1, w2, b2, *, hidden_dim, num_classes,
                  return_features, batch_tile, vmem_limit_mb):
    B = x_nchw.shape[0]
    x2d = x_nchw.reshape(B, -1)          # (B,1,28,28) -> (B,784): metadata only
    D = x2d.shape[1]
    if D != 784:
        raise ValueError(f"入力サイズが不正です。expected=784, got={D}")

    H_pad = wpre.shape[1]
    H2 = w1.shape[1]
    C_pad = w2.shape[1]

    # Batch tiling: no padded copies of x.  Single full-batch block when it fits;
    # otherwise batch_tile-row blocks with a Pallas-masked ragged tail.
    if B <= batch_tile:
        TB = B
    else:
        assert batch_tile % _SUBLANE == 0, "batch_tile must be a multiple of 8"
        TB = batch_tile
    n_blocks = pl.cdiv(B, TB)

    x_spec = pl.BlockSpec((TB, D), lambda i: (i, 0))
    resident = lambda shape: pl.BlockSpec(shape, lambda i: (0, 0))  # weights stay put
    in_specs = [
        x_spec,
        resident((D, H_pad)),
        resident((1, H_pad)),
        resident((H_pad, H2)),
        resident((1, H2)),
        resident((H2, C_pad)),
        resident((1, C_pad)),
    ]
    out_spec_logits = pl.BlockSpec((TB, C_pad), lambda i: (i, 0))

    flops = 2 * B * (D * H_pad + H_pad * H2 + H2 * C_pad)
    transcendentals = B * H_pad  # tanh
    bytes_accessed = (
        B * D * x2d.dtype.itemsize                  # x streamed once, native dtype
        + D * H_pad * 2 + H_pad * 4                 # wpre (bf16) + bpre (f32)
        + H_pad * H2 * 2 + H2 * 4                   # w1 (bf16) + b1
        + H2 * C_pad * 2 + C_pad * 4                # w2 (bf16) + b2
        + B * C_pad * 2                             # logits (bf16)
        + (B * H_pad * 2 if return_features else 0)  # features (bf16)
    )
    compiler_params = pltpu.CompilerParams(
        dimension_semantics=("parallel",),          # megacore batch split on v7x
        vmem_limit_bytes=vmem_limit_mb * 1024 * 1024,
    )
    cost = pl.CostEstimate(
        flops=flops, transcendentals=transcendentals, bytes_accessed=bytes_accessed
    )

    args = (x2d, wpre, bpre, w1, b1, w2, b2)

    if return_features:
        out_pad, feat_pad = pl.pallas_call(
            _kernel_with_feat,
            out_shape=(
                jax.ShapeDtypeStruct((B, C_pad), jnp.bfloat16),   # padded logits
                jax.ShapeDtypeStruct((B, H_pad), jnp.bfloat16),   # padded features
            ),
            grid=(n_blocks,),
            in_specs=in_specs,
            out_specs=(out_spec_logits,
                       pl.BlockSpec((TB, H_pad), lambda i: (i, 0))),
            compiler_params=compiler_params,
            cost_estimate=cost,
        )(*args)
        out = out_pad[:, :num_classes].astype(jnp.float32)
        feat = feat_pad[:, :hidden_dim].astype(jnp.float32)
        return out, feat

    out_pad = pl.pallas_call(
        _kernel_no_feat,
        out_shape=jax.ShapeDtypeStruct((B, C_pad), jnp.bfloat16),
        grid=(n_blocks,),
        in_specs=in_specs,
        out_specs=out_spec_logits,
        compiler_params=compiler_params,
        cost_estimate=cost,
    )(*args)
    return out_pad[:, :num_classes].astype(jnp.float32)


def transfer_biokan_forward(x_nchw, prepared, return_features=False,
                            batch_tile=4096, vmem_limit_mb=48):
    """TransferBioKANModel('classification') forward.

    `prepared` comes from prepare_params(params) (one-time weight prep).
    Defaults (batch_tile=4096, vmem_limit_mb=48) are safe on v5e/v6e/v7x.
    On v5e/v6e (128 MiB VMEM) batch_tile=8192 with vmem_limit_mb≈80-96 is fine;
    keep batch_tile<=4096 / limit<=48 MiB on v7x (64 MiB VMEM per TC).
    """
    weights, meta = prepared
    return _forward_impl(
        x_nchw, weights["wpre"], weights["bpre"], weights["w1"], weights["b1"],
        weights["w2"], weights["b2"],
        hidden_dim=meta["hidden_dim"], num_classes=meta["num_classes"],
        return_features=return_features, batch_tile=batch_tile,
        vmem_limit_mb=vmem_limit_mb,
    )


# --------------------------------------------------------------------------- #
# Parameters & reference
# --------------------------------------------------------------------------- #
def init_params(key, hidden_dim=64, num_classes=10):
    """Deterministic PyTorch-style uniform(-1/sqrt(fan_in), 1/sqrt(fan_in)) init."""
    ks = jax.random.split(key, 3)

    def lin(k, fan_in, fan_out):
        bound = 1.0 / jnp.sqrt(fan_in)
        kw, kb = jax.random.split(k)
        w = jax.random.uniform(kw, (fan_in, fan_out), jnp.float32, -bound, bound)
        b = jax.random.uniform(kb, (1, fan_out), jnp.float32, -bound, bound)
        return w, b

    wpre, bpre = lin(ks[0], 784, hidden_dim)            # synthetic pretrained proj
    w1, b1 = lin(ks[1], hidden_dim, hidden_dim // 2)    # head Linear 1
    w2, b2 = lin(ks[2], hidden_dim // 2, num_classes)   # head Linear 2
    return dict(wpre=wpre, bpre=bpre, w1=w1, b1=b1, w2=w2, b2=b2)


def _reference(x_nchw, params):
    """Pure-JAX reference matching the kernel's bf16-matmul / f32-accumulate math."""
    B = x_nchw.shape[0]
    x = x_nchw.reshape(B, -1)
    feat = jnp.tanh(
        jnp.dot(x.astype(jnp.bfloat16), params["wpre"].astype(jnp.bfloat16),
                preferred_element_type=jnp.float32)
        + params["bpre"]
    )
    h = jnp.maximum(
        jnp.dot(feat.astype(jnp.bfloat16), params["w1"].astype(jnp.bfloat16),
                preferred_element_type=jnp.float32)
        + params["b1"],
        0.0,
    )
    out = jnp.dot(h.astype(jnp.bfloat16), params["w2"].astype(jnp.bfloat16),
                  preferred_element_type=jnp.float32) + params["b2"]
    return out, feat


if __name__ == "__main__":
    key = jax.random.PRNGKey(0)
    k_x, k_p = jax.random.split(key)

    B, H, C = 2, 64, 10
    x = jax.random.normal(k_x, (B, 1, 28, 28), jnp.float32)   # NCHW, like PyTorch
    params = init_params(k_p, hidden_dim=H, num_classes=C)
    prepared = prepare_params(params)                         # one-time weight prep

    # return_features=True path (both outputs)
    out, feat = transfer_biokan_forward(x, prepared, return_features=True)
    out = jax.block_until_ready(out)
    feat = jax.block_until_ready(feat)

    # return_features=False path (feat writeback compiled out)
    out_only = jax.block_until_ready(transfer_biokan_forward(x, prepared))

    ref_out, ref_feat = _reference(x, params)
    assert out.shape == (B, C) and feat.shape == (B, H) and out_only.shape == (B, C)
    # Kernel writes logits/features back as bf16 (lane-dense stores) -> bf16-level tol.
    assert jnp.allclose(out, ref_out, atol=2e-2, rtol=2e-2)
    assert jnp.allclose(out_only, ref_out, atol=2e-2, rtol=2e-2)
    assert jnp.allclose(feat, ref_feat, atol=2e-2, rtol=2e-2)

    print("KERNEL_OK")
</pallas_src>

<mosaic_0001>
module attributes {stable_mosaic.version = 11 : i64} {
  func.func @_kernel_with_feat(%arg0: i32, %arg1: memref<2x784xf32, #tpu.memory_space<vmem>>, %arg2: memref<784x128xbf16, #tpu.memory_space<vmem>>, %arg3: memref<1x128xf32, #tpu.memory_space<vmem>>, %arg4: memref<128x32xbf16, #tpu.memory_space<vmem>>, %arg5: memref<1x32xf32, #tpu.memory_space<vmem>>, %arg6: memref<32x128xbf16, #tpu.memory_space<vmem>>, %arg7: memref<1x128xf32, #tpu.memory_space<vmem>>, %arg8: memref<2x128xbf16, #tpu.memory_space<vmem>>, %arg9: memref<2x128xbf16, #tpu.memory_space<vmem>>) attributes {dimension_semantics = [#tpu.dimension_semantics<parallel>], iteration_bounds = array<i64: 1>, scalar_prefetch = 0 : i64, scratch_operands = 0 : i64, tpu.core_type = #tpu.core_type<tc>, window_params = [{transform_indices = @transform_0, window_bounds = array<i64: 2, 784>}, {pipeline_mode = #tpu.pipeline_mode<synchronous>, transform_indices = @transform_1, window_bounds = array<i64: 784, 128>}, {pipeline_mode = #tpu.pipeline_mode<synchronous>, transform_indices = @transform_2, window_bounds = array<i64: 1, 128>}, {pipeline_mode = #tpu.pipeline_mode<synchronous>, transform_indices = @transform_3, window_bounds = array<i64: 128, 32>}, {pipeline_mode = #tpu.pipeline_mode<synchronous>, transform_indices = @transform_4, window_bounds = array<i64: 1, 32>}, {pipeline_mode = #tpu.pipeline_mode<synchronous>, transform_indices = @transform_5, window_bounds = array<i64: 32, 128>}, {pipeline_mode = #tpu.pipeline_mode<synchronous>, transform_indices = @transform_6, window_bounds = array<i64: 1, 128>}, {transform_indices = @transform_7, window_bounds = array<i64: 2, 128>}, {transform_indices = @transform_8, window_bounds = array<i64: 2, 128>}]} {
    %c0 = arith.constant 0 : index
    %c0_0 = arith.constant 0 : index
    %0 = vector.load %arg1[%c0, %c0_0] : memref<2x784xf32, #tpu.memory_space<vmem>>, vector<2x784xf32>
    %1 = arith.truncf %0 : vector<2x784xf32> to vector<2x784xbf16>
    %c0_1 = arith.constant 0 : index
    %c0_2 = arith.constant 0 : index
    %2 = vector.load %arg2[%c0_1, %c0_2] : memref<784x128xbf16, #tpu.memory_space<vmem>>, vector<784x128xbf16>
    %cst = arith.constant dense<0.000000e+00> : vector<2x128xf32>
    %3 = tpu.matmul %1, %2, %cst {dimension_numbers = #tpu.dot_dimension_numbers<[1], [0], [0], [1], [0, 0, 1, 1], [], []>} : vector<2x784xbf16>, vector<784x128xbf16>, vector<2x128xf32> -> vector<2x128xf32>
    %c0_3 = arith.constant 0 : index
    %c0_4 = arith.constant 0 : index
    %4 = vector.load %arg3[%c0_3, %c0_4] : memref<1x128xf32, #tpu.memory_space<vmem>>, vector<1x128xf32>
    %5 = vector.broadcast %4 : vector<1x128xf32> to vector<2x128xf32>
    %6 = arith.addf %3, %5 : vector<2x128xf32>
    %7 = math.tanh %6 : vector<2x128xf32>
    %8 = arith.truncf %7 : vector<2x128xf32> to vector<2x128xbf16>
    %c0_5 = arith.constant 0 : index
    %c0_6 = arith.constant 0 : index
    %9 = vector.load %arg9[%c0_5, %c0_6] : memref<2x128xbf16, #tpu.memory_space<vmem>>, vector<2x128xbf16>
    tpu.vector_store %arg9[%c0_5, %c0_6], %8 {strides = array<i32>} : memref<2x128xbf16, #tpu.memory_space<vmem>>, vector<2x128xbf16>,
    %c0_7 = arith.constant 0 : index
    %c0_8 = arith.constant 0 : index
    %10 = vector.load %arg4[%c0_7, %c0_8] : memref<128x32xbf16, #tpu.memory_space<vmem>>, vector<128x32xbf16>
    %cst_9 = arith.constant dense<0.000000e+00> : vector<2x32xf32>
    %11 = tpu.matmul %8, %10, %cst_9 {dimension_numbers = #tpu.dot_dimension_numbers<[1], [0], [0], [1], [0, 0, 1, 1], [], []>} : vector<2x128xbf16>, vector<128x32xbf16>, vector<2x32xf32> -> vector<2x32xf32>
    %c0_10 = arith.constant 0 : index
    %c0_11 = arith.constant 0 : index
    %12 = vector.load %arg5[%c0_10, %c0_11] : memref<1x32xf32, #tpu.memory_space<vmem>>, vector<1x32xf32>
    %13 = vector.broadcast %12 : vector<1x32xf32> to vector<2x32xf32>
    %14 = arith.addf %11, %13 : vector<2x32xf32>
    %cst_12 = arith.constant 0.000000e+00 : f32
    %15 = vector.broadcast %cst_12 : f32 to vector<2x32xf32>
    %16 = arith.maximumf %14, %15 : vector<2x32xf32>
    %17 = arith.truncf %16 : vector<2x32xf32> to vector<2x32xbf16>
    %c0_13 = arith.constant 0 : index
    %c0_14 = arith.constant 0 : index
    %18 = vector.load %arg6[%c0_13, %c0_14] : memref<32x128xbf16, #tpu.memory_space<vmem>>, vector<32x128xbf16>
    %cst_15 = arith.constant dense<0.000000e+00> : vector<2x128xf32>
    %19 = tpu.matmul %17, %18, %cst_15 {dimension_numbers = #tpu.dot_dimension_numbers<[1], [0], [0], [1], [0, 0, 1, 1], [], []>} : vector<2x32xbf16>, vector<32x128xbf16>, vector<2x128xf32> -> vector<2x128xf32>
    %c0_16 = arith.constant 0 : index
    %c0_17 = arith.constant 0 : index
    %20 = vector.load %arg7[%c0_16, %c0_17] : memref<1x128xf32, #tpu.memory_space<vmem>>, vector<1x128xf32>
    %21 = vector.broadcast %20 : vector<1x128xf32> to vector<2x128xf32>
    %22 = arith.addf %19, %21 : vector<2x128xf32>
    %23 = arith.truncf %22 : vector<2x128xf32> to vector<2x128xbf16>
    %c0_18 = arith.constant 0 : index
    %c0_19 = arith.constant 0 : index
    %24 = vector.load %arg8[%c0_18, %c0_19] : memref<2x128xbf16, #tpu.memory_space<vmem>>, vector<2x128xbf16>
    tpu.vector_store %arg8[%c0_18, %c0_19], %23 {strides = array<i32>} : memref<2x128xbf16, #tpu.memory_space<vmem>>, vector<2x128xbf16>,
    return
  }
  func.func @transform_0(%arg0: i32) -> (i32, i32) {
    %c0_i32 = arith.constant 0 : i32
    %c0_i32_0 = arith.constant 0 : i32
    return %arg0, %c0_i32 : i32, i32
  }
  func.func @transform_1(%arg0: i32) -> (i32, i32) {
    %c0_i32 = arith.constant 0 : i32
    %c0_i32_0 = arith.constant 0 : i32
    %c0_i32_1 = arith.constant 0 : i32
    return %c0_i32, %c0_i32_0 : i32, i32
  }
  func.func @transform_2(%arg0: i32) -> (i32, i32) {
    %c0_i32 = arith.constant 0 : i32
    %c0_i32_0 = arith.constant 0 : i32
    %c0_i32_1 = arith.constant 0 : i32
    return %c0_i32, %c0_i32_0 : i32, i32
  }
  func.func @transform_3(%arg0: i32) -> (i32, i32) {
    %c0_i32 = arith.constant 0 : i32
    %c0_i32_0 = arith.constant 0 : i32
    %c0_i32_1 = arith.constant 0 : i32
    return %c0_i32, %c0_i32_0 : i32, i32
  }
  func.func @transform_4(%arg0: i32) -> (i32, i32) {
    %c0_i32 = arith.constant 0 : i32
    %c0_i32_0 = arith.constant 0 : i32
    %c0_i32_1 = arith.constant 0 : i32
    return %c0_i32, %c0_i32_0 : i32, i32
  }
  func.func @transform_5(%arg0: i32) -> (i32, i32) {
    %c0_i32 = arith.constant 0 : i32
    %c0_i32_0 = arith.constant 0 : i32
    %c0_i32_1 = arith.constant 0 : i32
    return %c0_i32, %c0_i32_0 : i32, i32
  }
  func.func @transform_6(%arg0: i32) -> (i32, i32) {
    %c0_i32 = arith.constant 0 : i32
    %c0_i32_0 = arith.constant 0 : i32
    %c0_i32_1 = arith.constant 0 : i32
    return %c0_i32, %c0_i32_0 : i32, i32
  }
  func.func @transform_7(%arg0: i32) -> (i32, i32) {
    %c0_i32 = arith.constant 0 : i32
    %c0_i32_0 = arith.constant 0 : i32
    return %arg0, %c0_i32 : i32, i32
  }
  func.func @transform_8(%arg0: i32) -> (i32, i32) {
    %c0_i32 = arith.constant 0 : i32
    %c0_i32_0 = arith.constant 0 : i32
    return %arg0, %c0_i32 : i32, i32
  }
}

</mosaic_0001>

<bundles_post_ra>
// kernel: _forward_impl.1
= control target key start
LH: loop header
LB: loop body
LE: loop exit
PB: predicated region body
PF: predicated region fallthrough
CT: control target
= control target key end

     0   :  { %14 = vsyncpa [#allocation3], 0  ;;  %s1029_s30 = smov [#allocation2]   ;;  %s1030_s10 = smov 64   ;;  %s1131_s0 = inlined_call_operand.vmem [shape: f32[2,784], index: 0, kind: input, shape index: {}]   ;;  %s1132_s1 = inlined_call_operand.hbm [shape: bf16[784,128], index: 1, kind: input, shape index: {}]   ;;  %s1133_s2 = inlined_call_operand.vmem [shape: f32[1,128], index: 2, kind: input, shape index: {}]   ;;  %s1134_s3 = inlined_call_operand.vmem [shape: bf16[128,32], index: 3, kind: input, shape index: {}]   ;;  %s1135_s4 = inlined_call_operand.vmem [shape: f32[1,32], index: 4, kind: input, shape index: {}]   ;;  %s1136_s5 = inlined_call_operand.vmem [shape: bf16[32,128], index: 5, kind: input, shape index: {}]   ;;  %s1137_s6 = inlined_call_operand.vmem [shape: f32[1,128], index: 6, kind: input, shape index: {}]   ;;  %s1138_s7 = inlined_call_operand.vmem [shape: bf16[2,128], index: 7, kind: output, shape index: {0}]   ;;  %s1139_s8 = inlined_call_operand.vmem [shape: bf16[2,128], index: 8, kind: output, shape index: {1}]  }
   0x1   :  { %s21_s29 = sshll.u32 %s1132_s1, 4  ;;  %s23_s9 = sshll.u32 %s1029_s30, 4  ;;  %s22_s29 = int_to_ptr.hbm [resolvable:$true] %s21_s29  ;;  %s24_s9 = int_to_ptr.vmem [resolvable:$true] %s23_s9 }
   0x2   :  { %s1031_s11 = smov 4  }
   0x3   :  { %29 = dma.hbm_to_vmem [thread:$0]  %s22_s29, 6272, %s24_s9, [#allocation3], %s1030_s10, %s1030_s10, %s1031_s11  }
   0x4   :  { %1027 = dma.done.wait [#allocation3], 6272  }
   0x5   :  { %1028 = vsyncadd [#allocation3], 4294961024  ;;  %v943_v0 = vld [vmem:[#allocation2 + $0x38] sm:$0xff]  ;;  %v942_v3 = vld [vmem:[#allocation2 + $0x30] sm:$0xff]  ;;  %vm469_vm0 = vcmask 130048   ;;  %vm670_vm1 = vcmask 261120  }
   0x6   :  { %v951_v1 = vld [vmem:[#allocation2 + $0x78] sm:$0xff]  ;;  %473 = vmatpush.bf16.msra.mxu0 %v943_v0  ;;  %v950_v4 = vld [vmem:[#allocation2 + $0x70] sm:$0xff]  ;;  %v941_v8 = vld [vmem:[#allocation2 + $0x28] sm:$0xff] }
   0x7   :  { %v959_v2 = vld [vmem:[#allocation2 + $0xb8] sm:$0xff]  ;;  %486 = vmatpush.bf16.msra.mxu1 %v951_v1  ;;  %v958_v5 = vld [vmem:[#allocation2 + $0xb0] sm:$0xff]  ;;  %v949_v9 = vld [vmem:[#allocation2 + $0x68] sm:$0xff] }
   0x8   :  { %499 = vmatpush.bf16.msra.mxu2 %v959_v2  ;;  %v967_v6 = vld [vmem:[#allocation2 + $0xf8] sm:$0xff]  ;;  %v966_v7 = vld [vmem:[#allocation2 + $0xf0] sm:$0xff]  ;;  %v957_v10 = vld [vmem:[#allocation2 + $0xa8] sm:$0xff] }
   0x9   :  { %512 = vmatpush.bf16.msra.mxu3 %v967_v6  ;;  %v965_v11 = vld [vmem:[#allocation2 + $0xe8] sm:$0xff]  ;;  %v940_v12 = vld [vmem:[#allocation2 + $0x20] sm:$0xff]  ;;  %v45_v15 = vld [vmem:[%s1131_s0] sm:$0xff] }
   0xa   :  { %474 = vmatpush.bf16.msra.mxu0 %v942_v3  ;;  %v948_v13 = vld [vmem:[#allocation2 + $0x60] sm:$0xff]  ;;  %49 = vst [vmem:[#allocation1] ss:$4 sm:$0xff] %v45_v15  ;;  %v939_v17 = vld [vmem:[#allocation2 + $0x18] sm:$0xff]  ;;  %v938_v22 = vld [vmem:[#allocation2 + $0x10] sm:$0xff] }
   0xb   :  { %487 = vmatpush.bf16.msra.mxu1 %v950_v4  ;;  %v956_v14 = vld [vmem:[#allocation2 + $0xa0] sm:$0xff]  ;;  %v947_v18 = vld [vmem:[#allocation2 + $0x58] sm:$0xff]  ;;  %v946_v23 = vld [vmem:[#allocation2 + $0x50] sm:$0xff] }
   0xc   :  { %500 = vmatpush.bf16.msra.mxu2 %v958_v5  ;;  %v964_v16 = vld [vmem:[#allocation2 + $0xe0] sm:$0xff]  ;;  %v955_v20 = vld [vmem:[#allocation2 + $0x98] sm:$0xff]  ;;  %v954_v24 = vld [vmem:[#allocation2 + $0x90] sm:$0xff] }
   0xd   :  { %513 = vmatpush.bf16.msra.mxu3 %v966_v7  ;;  %v46_v19 = vld [vmem:[%s1131_s0 + $0x8] sm:$0x3f]  ;;  %v963_v21 = vld [vmem:[#allocation2 + $0xd8] sm:$0xff]  ;;  %v962_v25 = vld [vmem:[#allocation2 + $0xd0] sm:$0xff] }
   0xe   :  { %475 = vmatpush.bf16.msra.mxu0 %v941_v8  ;;  %51 = vst [vmem:[#allocation1 + $0x20] ss:$4 sm:$0xff] %v46_v19  ;;  %v937_v26 = vld [vmem:[#allocation2 + $0x8] sm:$0xff]  ;;  %v936_v29 = vld [vmem:[#allocation2] sm:$0xff]  ;;  %v975_v34 = vld [vmem:[#allocation2 + $0x138] sm:$0xff] }
   0xf   :  { %488 = vmatpush.bf16.msra.mxu1 %v949_v9  ;;  %v945_v27 = vld [vmem:[#allocation2 + $0x48] sm:$0xff]  ;;  %v944_v30 = vld [vmem:[#allocation2 + $0x40] sm:$0xff]  ;;  %v983_v35 = vld [vmem:[#allocation2 + $0x178] sm:$0xff] }
  0x10   :  { %501 = vmatpush.bf16.msra.mxu2 %v957_v10  ;;  %v953_v28 = vld [vmem:[#allocation2 + $0x88] sm:$0xff]  ;;  %v952_v36 = vld [vmem:[#allocation2 + $0x80] sm:$0xff]  ;;  %v974_v43 = vld [vmem:[#allocation2 + $0x130] sm:$0xff] }
  0x11   :  { %514 = vmatpush.bf16.msra.mxu3 %v965_v11  ;;  %v961_v31 = vld [vmem:[#allocation2 + $0xc8] sm:$0xff]  ;;  %v52_v32 = vld.sshfl [vmem:[#allocation1] sm:$0xff pattern:$0x73625140]  ;;  %v960_v40 = vld [vmem:[#allocation2 + $0xc0] sm:$0xff] }
  0x12   :  { %476 = vmatpush.bf16.msra.mxu0 %v940_v12  ;;  %v53_v33 = vld.sshfl [vmem:[#allocation1 + $0x8] sm:$0xff pattern:$0x73625140]  ;;  %v54_v37 = vld.sshfl [vmem:[#allocation1 + $0x10] sm:$0xff pattern:$0x73625140]  ;;  %v66_v38 = vpack.c.bf16 %v52_v32, %v52_v32 }
  0x13   :  { %489 = vmatpush.bf16.msra.mxu1 %v948_v13  ;;  %v67_v39 = vpack.c.bf16 %v53_v33, %v53_v33  ;;  %v984_v41 = vld [vmem:[#allocation2 + $0x180] sm:$0xff]  ;;  %v55_v42 = vld.sshfl [vmem:[#allocation1 + $0x18] sm:$0xff pattern:$0x73625140]  ;;  %v68_v45 = vpack.c.bf16 %v54_v37, %v54_v37  ;;  %v973_v47 = vld [vmem:[#allocation2 + $0x128] sm:$0xff] }
  0x14   :  { %502 = vmatpush.bf16.msra.mxu2 %v956_v14  ;;  %v982_v44 = vld [vmem:[#allocation2 + $0x170] sm:$0xff]  ;;  %v69_v46 = vpack.c.bf16 %v55_v42, %v55_v42  ;;  %v981_v48 = vld [vmem:[#allocation2 + $0x168] sm:$0xff]  ;;  %v972_v49 = vld [vmem:[#allocation2 + $0x120] sm:$0xff] }
  0x15   :  { %515 = vmatpush.bf16.msra.mxu3 %v964_v16  ;;  %v980_v50 = vld [vmem:[#allocation2 + $0x160] sm:$0xff]  ;;  %v971_v51 = vld [vmem:[#allocation2 + $0x118] sm:$0xff]  ;;  %v58_v53 = vld.sshfl [vmem:[#allocation1 + $0x30] sm:$0xff pattern:$0x73625140] }
  0x16   :  { %477 = vmatpush.bf16.msra.mxu0 %v939_v17  ;;  %v979_v52 = vld [vmem:[#allocation2 + $0x158] sm:$0xff]  ;;  %v970_v54 = vld [vmem:[#allocation2 + $0x110] sm:$0xff]  ;;  %v72_v56 = vpack.c.bf16 %v58_v53, %v58_v53  ;;  %v969_v57 = vld [vmem:[#allocation2 + $0x108] sm:$0xff] }
  0x17   :  { %490 = vmatpush.bf16.msra.mxu1 %v947_v18  ;;  %v978_v55 = vld [vmem:[#allocation2 + $0x150] sm:$0xff]  ;;  %v977_v58 = vld [vmem:[#allocation2 + $0x148] sm:$0xff]  ;;  %v968_v59 = vld [vmem:[#allocation2 + $0x100] sm:$0xff] }
  0x18   :  { %503 = vmatpush.bf16.msra.mxu2 %v955_v20  ;;  %v976_v60 = vld [vmem:[#allocation2 + $0x140] sm:$0xff]  ;;  %v56_v61 = vld.sshfl [vmem:[#allocation1 + $0x20] sm:$0xff pattern:$0x73625140]  ;;  %v992_v1 = vld [vmem:[%s1134_s3 + $0x38] sm:$0xff] }
  0x19   :  { %516 = vmatpush.bf16.msra.mxu3 %v963_v21  ;;  %v57_v62 = vld.sshfl [vmem:[#allocation1 + $0x28] sm:$0xff pattern:$0x73625140]  ;;  %v70_v63 = vpack.c.bf16 %v56_v61, %v56_v61  ;;  %v991_v2 = vld [vmem:[%s1134_s3 + $0x30] sm:$0xff]  ;;  %v989_v4 = vld [vmem:[%s1134_s3 + $0x20] sm:$0xff] }
  0x1a   :  { %478 = vmatpush.bf16.msra.mxu0 %v938_v22  ;;  %v71_v0 = vpack.c.bf16 %v57_v62, %v57_v62  ;;  %v990_v3 = vld [vmem:[%s1134_s3 + $0x28] sm:$0xff]  ;;  %v988_v5 = vld [vmem:[%s1134_s3 + $0x18] sm:$0xff]  ;;  %v987_v8 = vld [vmem:[%s1134_s3 + $0x10] sm:$0xff] }
  0x1b   :  { %491 = vmatpush.bf16.msra.mxu1 %v946_v23  ;;  %v986_v9 = vld [vmem:[%s1134_s3 + $0x8] sm:$0xff]  ;;  %v985_v10 = vld [vmem:[%s1134_s3] sm:$0xff] }
  0x1c   :  { %504 = vmatpush.bf16.msra.mxu2 %v954_v24  ;;  %v998_v15 = vld [vmem:[%s1133_s2] ss:$0 sm:$0xff]  ;;  %v994_v16 = vld [vmem:[%s1136_s5 + $0x8] sm:$0xff] }
  0x1d   :  { %517 = vmatpush.bf16.msra.mxu3 %v962_v25  ;;  %v993_v17 = vld [vmem:[%s1136_s5] sm:$0xff] }
  0x1e   :  { %479 = vmatpush.bf16.msra.mxu0 %v937_v26 }
  0x1f   :  { %492 = vmatpush.bf16.msra.mxu1 %v945_v27 }
  0x20   :  { %505 = vmatpush.bf16.msra.mxu2 %v953_v28 }
  0x21   :  { %518 = vmatpush.bf16.msra.mxu3 %v961_v31 }
  0x22   :  { %480 = vmatpush.bf16.msra.mxu0 %v936_v29 }
  0x23   :  { %493 = vmatpush.bf16.msra.mxu1 %v944_v30 }
  0x24   :  { %506 = vmatpush.bf16.msra.mxu2 %v952_v36 }
  0x25   :  { %481 = vmatmul.bf16.vlgmr.msra.gmra.mxu0 %v66_v38  ;;  %519 = vmatpush.bf16.msra.mxu3 %v960_v40 }
  0x26   :  { %525 = vmatpush.bf16.msrb.mxu0 %v975_v34  ;;  %494 = vmatmul.bf16.vlgmr.msra.gmra.mxu1 %v67_v39 }
  0x27   :  { %538 = vmatpush.bf16.msrb.mxu1 %v983_v35  ;;  %507 = vmatmul.bf16.vlgmr.msra.gmra.mxu2 %v68_v45  ;;  %v999_v35 = vld [vmem:[%s1135_s4] ss:$0 sm:$0xff] }
  0x28   :  { %558 = vmatpush.bf16.msrb.mxu2 %v984_v41  ;;  %520 = vmatmul.bf16.vlgmr.msra.gmra.mxu3 %v69_v46  ;;  %v1000_v41 = vld [vmem:[%s1137_s6] ss:$0 sm:$0xff] }
  0x29   :  { %635 = vmatpush.bf16.msrb.mxu3 %v992_v1 }
  0x2a   :  { %526 = vmatpush.bf16.msrb.mxu0 %v974_v43 }
  0x2b   :  { %539 = vmatpush.bf16.msrb.mxu1 %v982_v44 }
  0x2c   :  { %680 = vmatpush.bf16.msra.mxu2 %v994_v16 }
  0x2d   :  { %636 = vmatpush.bf16.msrb.mxu3 %v991_v2 }
  0x2e   :  { %527 = vmatpush.bf16.msrb.mxu0 %v973_v47 }
  0x2f   :  { %540 = vmatpush.bf16.msrb.mxu1 %v981_v48 }
  0x30   :  { %681 = vmatpush.bf16.msra.mxu2 %v993_v17 }
  0x31   :  { %637 = vmatpush.bf16.msrb.mxu3 %v990_v3 }
  0x32   :  { %528 = vmatpush.bf16.msrb.mxu0 %v972_v49 }
  0x33   :  { %541 = vmatpush.bf16.msrb.mxu1 %v980_v50 }
  0x35   :  { %638 = vmatpush.bf16.msrb.mxu3 %v989_v4 }
  0x36   :  { %529 = vmatpush.bf16.msrb.mxu0 %v971_v51 }
  0x37   :  { %542 = vmatpush.bf16.msrb.mxu1 %v979_v52  ;;  %894 = vmatmul.msk.bf16.vlgmr.msrb.gmra.mxu2 %vm469_vm0, %v72_v56 }
  0x39   :  { %639 = vmatpush.bf16.msrb.mxu3 %v988_v5 }
  0x3a   :  { %530 = vmatpush.bf16.msrb.mxu0 %v970_v54 }
  0x3b   :  { %543 = vmatpush.bf16.msrb.mxu1 %v978_v55 }
  0x3d   :  { %640 = vmatpush.bf16.msrb.mxu3 %v987_v8 }
  0x3e   :  { %531 = vmatpush.bf16.msrb.mxu0 %v969_v57 }
  0x3f   :  { %544 = vmatpush.bf16.msrb.mxu1 %v977_v58 }
  0x41   :  { %641 = vmatpush.bf16.msrb.mxu3 %v986_v9 }
  0x42   :  { %532 = vmatpush.bf16.msrb.mxu0 %v968_v59 }
  0x43   :  { %545 = vmatpush.bf16.msrb.mxu1 %v976_v60 }
  0x45   :  { %533 = vmatmul.bf16.vlgmr.msrb.gmra.mxu0 %v70_v63  ;;  %642 = vmatpush.bf16.msrb.mxu3 %v985_v10 }
  0x46   :  { %546 = vmatmul.bf16.vlgmr.msrb.gmra.mxu1 %v71_v0 }
  0xa2   :  { %v482_v6 = vpop.f32.mrf.mxu0 }
  0xa3   :  { %v495_v7 = vpop.f32.mrf.mxu1  ;;  %v483_v18 = vadd.f32 %v998_v15, %v482_v6 }
  0xa5   :  { %v496_v21 = vadd.f32 %v495_v7, %v483_v18 }
  0xaa   :  { %v484_v11 = vpop.f32.mrf.mxu0  ;;  %v508_v13 = vpop.f32.mrf.mxu2 }
  0xab   :  { %v497_v12 = vpop.f32.mrf.mxu1  ;;  %v521_v14 = vpop.f32.mrf.mxu3  ;;  %v509_v22 = vadd.f32 %v508_v13, %v496_v21 }
  0xad   :  { %v522_v24 = vadd.f32 %v521_v14, %v509_v22 }
  0xb2   :  { %v510_v19 = vpop.f32.mrf.mxu2 }
  0xb3   :  { %v523_v20 = vpop.f32.mrf.mxu3 }
  0xba   :  { %v560_v23 = vpop.f32.mrf.mxu2 }
  0xc2   :  { %v534_v25 = vpop.f32.mrf.mxu0  ;;  %v562_v29 = vpop.f32.mrf.mxu2 }
  0xc3   :  { %v547_v26 = vpop.f32.mrf.mxu1  ;;  %v535_v27 = vadd.f32 %v534_v25, %v522_v24 }
  0xc5   :  { %v548_v28 = vadd.f32 %v547_v26, %v535_v27 }
  0xc7   :  { %v561_v30 = vadd.f32 %v560_v23, %v548_v28 }
  0xc9   :  { %1001 = vtanh.f32 %v561_v30 }
  0xca   :  { %v536_v31 = vpop.f32.mrf.mxu0 }
  0xcb   :  { %v549_v32 = vpop.f32.mrf.mxu1 }
  0xcf   :  { %v1002_v33 = vpop.eup %1001 }
  0xd0   :  { %v565_v34 = vpack.c.bf16 %v1002_v33, %v1002_v33 }
  0xd2   :  { %566 = vst [vmem:[%s1139_s8] sm:$0x1] %v565_v34  ;;  %643 = vmatmul.bf16.vlgmr.msrb.gmra.mxu3 %v565_v34 }
 0x155   :  { %v644_v36 = vpop.f32.mrf.mxu3 }
 0x156   :  { %v645_v37 = vadd.f32 %v999_v35, %v644_v36 }
 0x158   :  { %v648_v38 = vmax.f32 %v645_v37, 0.0 }
 0x15a   :  { %v649_v39 = vpack.c.bf16 %v648_v38, %v648_v38 }
 0x15c   :  { %935 = vmatmul.msk.bf16.vlgmr.msra.gmra.mxu2 %vm670_vm1, %v649_v39 }
 0x15d   :  { %v646_v40 = vpop.f32.mrf.mxu3 }
 0x1df   :  { %v683_v42 = vpop.f32.mrf.mxu2 }
 0x1e0   :  { %v684_v43 = vadd.f32 %v1000_v41, %v683_v42 }
 0x1e2   :  { %v687_v44 = vpack.c.bf16 %v684_v43, %v684_v43 }
 0x1e4   :  { %688 = vst [vmem:[%s1138_s7] sm:$0x1] %v687_v44 }
 0x1e7   :  { %v685_v45 = vpop.f32.mrf.mxu2 }
 0x1e8   :  { %697 = vsyncpa [#allocation3], 1 }

</bundles_post_ra>
